<compile_context>
chip_gen: v7x
topology: tpu7x:2x2x1
jax: 0.10.0
libtpu: 0.0.40
codegen_flags: <defaults>
</compile_context>

<pallas_src>
import functools

import jax
import jax.numpy as jnp
from jax.experimental import pallas as pl
from jax.experimental.pallas import tpu as pltpu


def _rup(v, m):
    return -(-v // m) * m


def _vmem_block_bytes(shape, itemsize):
    """VMEM footprint estimate with (sublane, 128) tiling on the last two dims."""
    sub = {4: 8, 2: 16, 1: 32}.get(itemsize, 8)
    lead = 1
    for d in shape[:-2]:
        lead *= d
    return lead * _rup(shape[-2], sub) * _rup(shape[-1], 128) * itemsize


def _spec(block_shape, index_map, single_buffer=False):
    """BlockSpec; single_buffer=True requests 1-deep pipelining for constant-index
    operands (the 2nd buffer is pure VMEM waste). Graceful fallback if unavailable."""
    if single_buffer and hasattr(pl, "Buffered"):
        try:
            return pl.BlockSpec(block_shape, index_map, pipeline_mode=pl.Buffered(1))
        except TypeError:
            pass
    return pl.BlockSpec(block_shape, index_map)


def _conv_bn_lrelu_kernel(x_ref, w_ref, shift_ref, o_ref, *, t_ho, Wo, align):
    # x_ref:     (2, S, 3*Cin) bf16  -- whole column-overlapped padded image of one
    #            batch element; element (p, i*Wo + j, kx*Cin + c) == x_pad[2i+p, 2j+kx, c]
    # w_ref:     (3, 3*Cin, TC) bf16 -- BN-scale-folded weights, one ky per leading index
    # shift_ref: (1, TC)        f32  -- BN shift for this Cout block
    # o_ref:     (t_ho*Wo, TC)       -- output pixels of this (batch, cblk, rowblk) tile
    r = pl.program_id(2)
    L = t_ho * Wo
    base = pl.multiple_of(r * L, align)

    acc = jnp.zeros((L, o_ref.shape[-1]), jnp.float32)
    # Row taps ky=0,1,2 hit padded rows 2i, 2i+1, 2i+2 == (dy,p) = (0,0), (0,1), (1,0).
    # Each tap is a contiguous sublane slab of the flattened (row, col) pixel grid.
    for ky, (dy, py) in enumerate(((0, 0), (0, 1), (1, 0))):
        lhs = x_ref[py, pl.ds(base + dy * Wo, L), :]          # (L, 3*Cin), no copy math
        acc += jnp.dot(lhs, w_ref[ky], preferred_element_type=jnp.float32)

    y = acc + shift_ref[...]
    y = jnp.where(y > 0, y, 0.1 * y)                          # LeakyReLU(0.1)
    o_ref[...] = y.astype(o_ref.dtype)


@functools.partial(jax.jit, static_argnames=("block_rows",))
def downsample_layer(x_nchw, w, gamma, beta, running_mean, running_var,
                     eps=1e-5, block_rows=512):
    """Conv(3x3, s=2, p=1, bias=False) + BatchNorm (eval) + LeakyReLU(0.1).

    x_nchw: (N, Cin, H, W)   w: (Cout, Cin, 3, 3)   returns (N, Cout, Ho, Wo).
    """
    N, Cin, H, W = x_nchw.shape
    Cout = w.shape[0]
    Ho = (H - 1) // 2 + 1            # == (H + 2*1 - 3)//2 + 1
    Wo = (W - 1) // 2 + 1
    out_dtype = x_nchw.dtype
    itemsize = jnp.dtype(out_dtype).itemsize
    sub = {4: 8, 2: 16, 1: 32}.get(itemsize, 8)   # sublane tile of the OUTPUT dtype

    # ---- output-row tiling: big tiles amortize grid overhead / tall MXU LHS ----
    t_ho = max(1, min(Ho, block_rows // max(Wo, 1)))
    while t_ho < Ho and (t_ho * Wo) % sub != 0:   # keep out-tile sublane aligned
        t_ho += 1
    if (t_ho * Wo) % sub != 0:
        t_ho = Ho                                 # single tile: full-dim block is legal
    else:
        for t in range(t_ho, min(Ho, 2 * t_ho) + 1):   # prefer divisor: Ho_pad == Ho
            if Ho % t == 0 and (t * Wo) % sub == 0:
                t_ho = t
                break
    R = pl.cdiv(Ho, t_ho)
    Ho_pad = R * t_ho
    L = t_ho * Wo
    align = 16 if L % 16 == 0 else (8 if L % 8 == 0 else 1)

    # ---- Cout blocking: lane-dense stores (multiple of 128), <=256-wide blocks ----
    Cout_p = _rup(Cout, 128)
    TC = 256 if Cout_p % 256 == 0 else 128
    CB = Cout_p // TC

    # ---- input glue: NHWC bf16, conv padding, column-overlap ("triple") layout ----
    # element (n, p, i*Wo + j, kx*Cin + c) == x_pad[n, 2i + p, 2j + kx, c]
    x = jnp.transpose(x_nchw, (0, 2, 3, 1)).astype(jnp.bfloat16)
    Hp = 2 * Ho_pad + 2                     # padded rows 0 .. 2*Ho_pad+1
    Wp = 2 * Wo + 1                         # padded cols 0 .. 2*Wo
    xp = jnp.pad(x, ((0, 0), (1, Hp - 1 - H), (1, Wp - 1 - W), (0, 0)))
    xp = xp.reshape(N, Ho_pad + 1, 2, Wp, Cin)        # split row parity (free)
    xp = jnp.transpose(xp, (0, 2, 1, 3, 4))           # (N, 2, Ho_pad+1, Wp, Cin)
    xov = jnp.concatenate(
        [xp[..., 0:2 * Wo - 1:2, :],                  # col 2j   (kx=0)
         xp[..., 1:2 * Wo:2, :],                      # col 2j+1 (kx=1)
         xp[..., 2:2 * Wo + 1:2, :]],                 # col 2j+2 (kx=2)
        axis=-1)                                      # (N, 2, Ho_pad+1, Wo, 3*Cin)
    S = (Ho_pad + 1) * Wo
    xov = xov.reshape(N, 2, S, 3 * Cin)
    # TODO(synk): in a full network keep activations in this bf16 NHWC/overlap layout
    # end-to-end so the transpose/pad/concat glue and the output crop/transpose stop
    # costing an extra HBM round trip per layer (here they are kept for NCHW parity
    # with the PyTorch module interface).

    # ---- fold BatchNorm (eval): scale into the weights, shift stays f32 ----
    scale = gamma.astype(jnp.float32) * jax.lax.rsqrt(
        running_var.astype(jnp.float32) + eps)
    shift = beta.astype(jnp.float32) - running_mean.astype(jnp.float32) * scale
    wt = jnp.transpose(w.astype(jnp.float32), (2, 3, 1, 0)) * scale    # (3,3,Cin,Cout)
    wk = wt.reshape(3, 3 * Cin, Cout)                                  # K = kx*Cin + c
    wk = jnp.pad(wk, ((0, 0), (0, 0), (0, Cout_p - Cout))).astype(jnp.bfloat16)
    shift = jnp.pad(shift, (0, Cout_p - Cout)).reshape(1, Cout_p)

    # ---- explicit VMEM budget with per-generation cap and headroom ----
    x_blk = _vmem_block_bytes((2, S, 3 * Cin), 2)            # single-buffered
    w_blk = _vmem_block_bytes((3, 3 * Cin, TC), 2)           # single-buffered
    s_blk = _vmem_block_bytes((1, TC), 4)                    # single-buffered
    o_blk = _vmem_block_bytes((L, TC), itemsize)             # double-buffered
    a_blk = _vmem_block_bytes((L, TC), 4)                    # f32 accumulator temps
    vmem_need = x_blk + w_blk + s_blk + 2 * o_blk + 2 * a_blk + (4 << 20)
    try:
        vmem_cap = int(pltpu.get_tpu_info().vmem_capacity_bytes)
    except Exception:
        vmem_cap = 64 << 20
    vmem_limit = int(min(max(vmem_need, 32 << 20), vmem_cap - (8 << 20)))
    # TODO(synk): for images too large to keep one overlapped batch image resident in
    # VMEM, switch the image to memory_space=pl.ANY + manual double-buffered DMA over
    # overlapping (t_ho+1)-row windows (also the N==1 megacore split with a 1-row halo).

    kernel = functools.partial(_conv_bn_lrelu_kernel, t_ho=t_ho, Wo=Wo, align=align)
    flops = 2 * N * Ho_pad * Wo * 3 * (3 * Cin) * Cout_p
    bytes_accessed = (xov.size * 2 + wk.size * 2 + shift.size * 4
                      + N * Ho_pad * Wo * Cout_p * itemsize)

    out = pl.pallas_call(
        kernel,
        out_shape=jax.ShapeDtypeStruct((N, Ho_pad * Wo, Cout_p), out_dtype),
        grid_spec=pltpu.PrefetchScalarGridSpec(
            num_scalar_prefetch=0,
            grid=(N, CB, R),                       # row-block axis fastest
            in_specs=[
                # Whole overlapped image of one batch element: block index is constant
                # over the (cout-block, row-block) axes, so it is DMA'd into VMEM once
                # per batch element and reused; single-buffered because a 2nd buffer
                # would only hide the NEXT batch element's DMA at 2x residency.
                _spec((None, 2, S, 3 * Cin), lambda b, c, r: (b, 0, 0, 0),
                      single_buffer=True),
                _spec((3, 3 * Cin, TC), lambda b, c, r: (0, 0, c), single_buffer=True),
                _spec((1, TC), lambda b, c, r: (0, c), single_buffer=True),
            ],
            out_specs=pl.BlockSpec((None, L, TC), lambda b, c, r: (b, r, c)),
        ),
        compiler_params=pltpu.CompilerParams(
            # Megacore shards on batch; the inner axes reuse the resident image so
            # marking them "parallel" would double-fetch it per core on v7x.
            dimension_semantics=("parallel", "arbitrary", "arbitrary"),
            vmem_limit_bytes=vmem_limit),
        cost_estimate=pl.CostEstimate(flops=flops, transcendentals=0,
                                      bytes_accessed=bytes_accessed),
    )(xov, wk, shift)

    # rows -> (N, Ho, Wo, Cout) -> NCHW (PyTorch parity)
    out = out.reshape(N, Ho_pad, Wo, Cout_p)[:, :Ho, :, :Cout]
    return jnp.transpose(out, (0, 3, 1, 2))


if __name__ == "__main__":
    key = jax.random.PRNGKey(0)
    k_x, k_w, k_g, k_b, k_m, k_v = jax.random.split(key, 6)

    N, Cin, H, W = 2, 4, 16, 16
    Cout = 8

    x = jax.random.normal(k_x, (N, Cin, H, W), dtype=jnp.float32)
    w = jax.random.normal(k_w, (Cout, Cin, 3, 3), dtype=jnp.float32) * 0.1
    gamma = 1.0 + 0.1 * jax.random.normal(k_g, (Cout,), dtype=jnp.float32)
    beta = 0.1 * jax.random.normal(k_b, (Cout,), dtype=jnp.float32)
    running_mean = 0.1 * jax.random.normal(k_m, (Cout,), dtype=jnp.float32)
    running_var = jnp.abs(jax.random.normal(k_v, (Cout,), dtype=jnp.float32)) + 0.5

    out = downsample_layer(x, w, gamma, beta, running_mean, running_var)
    out = jax.block_until_ready(out)

    # Reference in plain JAX (f32 conv + BN + LeakyReLU). The kernel feeds the MXU
    # bf16 operands with a f32 accumulator/epilogue -> loosened tolerance.
    ref = jax.lax.conv_general_dilated(
        x, w, window_strides=(2, 2), padding=((1, 1), (1, 1)),
        dimension_numbers=("NCHW", "OIHW", "NCHW"))
    scale = gamma / jnp.sqrt(running_var + 1e-5)
    shift = beta - running_mean * scale
    ref = ref * scale[None, :, None, None] + shift[None, :, None, None]
    ref = jnp.where(ref > 0, ref, 0.1 * ref)

    Ho, Wo = (H - 1) // 2 + 1, (W - 1) // 2 + 1
    assert out.shape == (N, Cout, Ho, Wo), out.shape
    max_err = float(jnp.abs(out - ref).max())
    assert jnp.allclose(out, ref, atol=5e-2, rtol=5e-2), max_err

    print("KERNEL_OK")
</pallas_src>

<mosaic_0001>
module attributes {stable_mosaic.version = 11 : i64} {
  func.func @_conv_bn_lrelu_kernel(%arg0: i32, %arg1: i32, %arg2: i32, %arg3: memref<1x2x72x12xbf16, #tpu.memory_space<vmem>>, %arg4: memref<3x12x128xbf16, #tpu.memory_space<vmem>>, %arg5: memref<1x128xf32, #tpu.memory_space<vmem>>, %arg6: memref<1x64x128xf32, #tpu.memory_space<vmem>>) attributes {dimension_semantics = [#tpu.dimension_semantics<parallel>, #tpu.dimension_semantics<arbitrary>, #tpu.dimension_semantics<arbitrary>], iteration_bounds = array<i64: 2, 1, 1>, scalar_prefetch = 0 : i64, scratch_operands = 0 : i64, tpu.core_type = #tpu.core_type<tc>, window_params = [{pipeline_mode = #tpu.pipeline_mode<synchronous>, transform_indices = @transform_0, window_bounds = array<i64: 1, 2, 72, 12>}, {pipeline_mode = #tpu.pipeline_mode<synchronous>, transform_indices = @transform_1, window_bounds = array<i64: 3, 12, 128>}, {pipeline_mode = #tpu.pipeline_mode<synchronous>, transform_indices = @transform_2, window_bounds = array<i64: 1, 128>}, {transform_indices = @transform_3, window_bounds = array<i64: 1, 64, 128>}]} {
    %c64_i32 = arith.constant 64 : i32
    %0 = arith.muli %arg2, %c64_i32 : i32
    %1 = tpu.assume_multiple %0, 16 : i32
    %cst = arith.constant 0.000000e+00 : f32
    %2 = vector.broadcast %cst : f32 to vector<64x128xf32>
    %c0_i32 = arith.constant 0 : i32
    %3 = arith.addi %1, %c0_i32 : i32
    %c0 = arith.constant 0 : index
    %c0_0 = arith.constant 0 : index
    %4 = arith.index_cast %3 : i32 to index
    %c0_1 = arith.constant 0 : index
    %5 = vector.load %arg3[%c0, %c0_0, %4, %c0_1] : memref<1x2x72x12xbf16, #tpu.memory_space<vmem>>, vector<1x1x64x12xbf16>
    %6 = vector.shape_cast %5 : vector<1x1x64x12xbf16> to vector<64x12xbf16>
    %c0_2 = arith.constant 0 : index
    %c0_3 = arith.constant 0 : index
    %c0_4 = arith.constant 0 : index
    %7 = vector.load %arg4[%c0_2, %c0_3, %c0_4] : memref<3x12x128xbf16, #tpu.memory_space<vmem>>, vector<1x12x128xbf16>
    %8 = vector.shape_cast %7 : vector<1x12x128xbf16> to vector<12x128xbf16>
    %cst_5 = arith.constant dense<0.000000e+00> : vector<64x128xf32>
    %9 = tpu.matmul %6, %8, %cst_5 {dimension_numbers = #tpu.dot_dimension_numbers<[1], [0], [0], [1], [0, 0, 1, 1], [], []>} : vector<64x12xbf16>, vector<12x128xbf16>, vector<64x128xf32> -> vector<64x128xf32>
    %10 = arith.addf %2, %9 : vector<64x128xf32>
    %c0_i32_6 = arith.constant 0 : i32
    %11 = arith.addi %1, %c0_i32_6 : i32
    %c0_7 = arith.constant 0 : index
    %c1 = arith.constant 1 : index
    %12 = arith.index_cast %11 : i32 to index
    %c0_8 = arith.constant 0 : index
    %13 = vector.load %arg3[%c0_7, %c1, %12, %c0_8] : memref<1x2x72x12xbf16, #tpu.memory_space<vmem>>, vector<1x1x64x12xbf16>
    %14 = vector.shape_cast %13 : vector<1x1x64x12xbf16> to vector<64x12xbf16>
    %c1_9 = arith.constant 1 : index
    %c0_10 = arith.constant 0 : index
    %c0_11 = arith.constant 0 : index
    %15 = vector.load %arg4[%c1_9, %c0_10, %c0_11] : memref<3x12x128xbf16, #tpu.memory_space<vmem>>, vector<1x12x128xbf16>
    %16 = vector.shape_cast %15 : vector<1x12x128xbf16> to vector<12x128xbf16>
    %cst_12 = arith.constant dense<0.000000e+00> : vector<64x128xf32>
    %17 = tpu.matmul %14, %16, %cst_12 {dimension_numbers = #tpu.dot_dimension_numbers<[1], [0], [0], [1], [0, 0, 1, 1], [], []>} : vector<64x12xbf16>, vector<12x128xbf16>, vector<64x128xf32> -> vector<64x128xf32>
    %18 = arith.addf %10, %17 : vector<64x128xf32>
    %c8_i32 = arith.constant 8 : i32
    %19 = arith.addi %1, %c8_i32 : i32
    %c0_13 = arith.constant 0 : index
    %c0_14 = arith.constant 0 : index
    %20 = arith.index_cast %19 : i32 to index
    %c0_15 = arith.constant 0 : index
    %21 = vector.load %arg3[%c0_13, %c0_14, %20, %c0_15] : memref<1x2x72x12xbf16, #tpu.memory_space<vmem>>, vector<1x1x64x12xbf16>
    %22 = vector.shape_cast %21 : vector<1x1x64x12xbf16> to vector<64x12xbf16>
    %c2 = arith.constant 2 : index
    %c0_16 = arith.constant 0 : index
    %c0_17 = arith.constant 0 : index
    %23 = vector.load %arg4[%c2, %c0_16, %c0_17] : memref<3x12x128xbf16, #tpu.memory_space<vmem>>, vector<1x12x128xbf16>
    %24 = vector.shape_cast %23 : vector<1x12x128xbf16> to vector<12x128xbf16>
    %cst_18 = arith.constant dense<0.000000e+00> : vector<64x128xf32>
    %25 = tpu.matmul %22, %24, %cst_18 {dimension_numbers = #tpu.dot_dimension_numbers<[1], [0], [0], [1], [0, 0, 1, 1], [], []>} : vector<64x12xbf16>, vector<12x128xbf16>, vector<64x128xf32> -> vector<64x128xf32>
    %26 = arith.addf %18, %25 : vector<64x128xf32>
    %c0_19 = arith.constant 0 : index
    %c0_20 = arith.constant 0 : index
    %27 = vector.load %arg5[%c0_19, %c0_20] : memref<1x128xf32, #tpu.memory_space<vmem>>, vector<1x128xf32>
    %28 = vector.broadcast %27 : vector<1x128xf32> to vector<64x128xf32>
    %29 = arith.addf %26, %28 : vector<64x128xf32>
    %cst_21 = arith.constant 0.000000e+00 : f32
    %30 = vector.broadcast %cst_21 : f32 to vector<64x128xf32>
    %31 = arith.cmpf ogt, %29, %30 : vector<64x128xf32>
    %cst_22 = arith.constant 1.000000e-01 : f32
    %32 = vector.broadcast %cst_22 : f32 to vector<64x128xf32>
    %33 = arith.mulf %32, %29 : vector<64x128xf32>
    %34 = arith.select %31, %29, %33 : vector<64x128xi1>, vector<64x128xf32>
    %c0_23 = arith.constant 0 : index
    %c0_24 = arith.constant 0 : index
    %c0_25 = arith.constant 0 : index
    %35 = vector.load %arg6[%c0_23, %c0_24, %c0_25] : memref<1x64x128xf32, #tpu.memory_space<vmem>>, vector<1x64x128xf32>
    %36 = vector.shape_cast %35 : vector<1x64x128xf32> to vector<64x128xf32>
    %37 = vector.shape_cast %34 : vector<64x128xf32> to vector<1x64x128xf32>
    tpu.vector_store %arg6[%c0_23, %c0_24, %c0_25], %37 {strides = array<i32>} : memref<1x64x128xf32, #tpu.memory_space<vmem>>, vector<1x64x128xf32>,
    return
  }
  func.func @transform_0(%arg0: i32, %arg1: i32, %arg2: i32) -> (i32, i32, i32, i32) {
    %c0_i32 = arith.constant 0 : i32
    %c0_i32_0 = arith.constant 0 : i32
    %c0_i32_1 = arith.constant 0 : i32
    %c0_i32_2 = arith.constant 0 : i32
    return %arg0, %c0_i32, %c0_i32_0, %c0_i32_1 : i32, i32, i32, i32
  }
  func.func @transform_1(%arg0: i32, %arg1: i32, %arg2: i32) -> (i32, i32, i32) {
    %c0_i32 = arith.constant 0 : i32
    %c0_i32_0 = arith.constant 0 : i32
    %c0_i32_1 = arith.constant 0 : i32
    return %c0_i32, %c0_i32_0, %arg1 : i32, i32, i32
  }
  func.func @transform_2(%arg0: i32, %arg1: i32, %arg2: i32) -> (i32, i32) {
    %c0_i32 = arith.constant 0 : i32
    %c0_i32_0 = arith.constant 0 : i32
    return %c0_i32, %arg1 : i32, i32
  }
  func.func @transform_3(%arg0: i32, %arg1: i32, %arg2: i32) -> (i32, i32, i32) {
    %c0_i32 = arith.constant 0 : i32
    return %arg0, %arg2, %arg1 : i32, i32, i32
  }
}

</mosaic_0001>

<bundles_post_ra>
// kernel: downsample_layer.1
= control target key start
LH: loop header
LB: loop body
LE: loop exit
PB: predicated region body
PF: predicated region fallthrough
CT: control target
= control target key end

     0   :  { %s1000_s12 = smov 0   ;;  %s1002_s13 = smov 0   ;;  %s1078_s0 = inlined_call_operand.vmem [shape: bf16[2,2,72,12], index: 0, kind: input, shape index: {}]   ;;  %s1079_s1 = inlined_call_operand.vmem [shape: bf16[3,12,128], index: 1, kind: input, shape index: {}]   ;;  %s1080_s2 = inlined_call_operand.vmem [shape: f32[1,128], index: 2, kind: input, shape index: {}]   ;;  %s1081_s3 = inlined_call_operand.vmem [shape: f32[2,64,128], index: 3, kind: output, shape index: {}]  }
   0x1   :  { %s1004_s14 = smov 0  }
   0x2 LB: > { %s32_s15 = sadd.s32 1, %s974_s13  ;;  %p794_p0 = scmp.ge.s32.totalorder %s978_s14, 1  ;;  %s978_s14 = sphi %s1004_s14, %s13_s14   ;;  %s974_s13 = sphi %s1002_s13, %s1083_s13   ;;  %s970_s12 = sphi %s1000_s12, %s1082_s12  }
   0x3   : > { %p34_p1 = scmp.ge.s32.totalorder %s32_s15, 2  ;;  %p177_p2 = scmp.lt.s32.totalorder %s978_s14, 3 }
   0x5   : > { %s1085_s15 = smov (%p34_p1, %s32_s15), 0  ;;  %p178_p3 = pnand %p794_p0, %p177_p2 }
   0x6   : > { %v941_v0 = vld [vmem:[%s1079_s1 + $0x8] sm:$0x3f] (!%p178_p3)   ;;  %vm308_vm0 = vcmask (!%p178_p3), 1045504   ;;  %p215_p4 = scmp.lt.s32.totalorder (!%p178_p3), %s970_s12, 1  ;;  %v942_v1 = vld [vmem:[%s1079_s1] sm:$0x3f] (!%p178_p3)  }
   0x7   : > { %181 = sbr.rel (%p178_p3) target bundleno = 264 (0x108), region = 32  ;;  %912 = vmatprep.subr.msk.bf16.mxu1 (!%p178_p3), %vm308_vm0, %v941_v0  ;;  %v310_v2 = vsel (!%p178_p3), %vm308_vm0, %v941_v0, 0  ;;  %v945_v3 = vld [vmem:[%s1079_s1 + $0x10] sm:$0x3f] (!%p178_p3)   ;;  %913 = vmatprep.subr.msk.bf16.mxu0 (!%p178_p3), %vm308_vm0, %v942_v1  ;;  %v415_v4 = vsel (!%p178_p3), %vm308_vm0, %v942_v1, 0  ;;  %vm295_vm1 = vcmask (!%p178_p3), 97280  }
   0x8   : > { %865 = vmatpush3.bf16.msra.mxu1 (!%p178_p3), %v310_v2  ;;  %875 = vmatpush3.bf16.msra.mxu0 (!%p178_p3), %v415_v4  ;;  %v536_v9 = vsel (!%p178_p3), %vm308_vm0, %v945_v3, 0  ;;  %v845_v23 = vld [vmem:[%s1080_s2] ss:$0 sm:$0xff] (!%p178_p3) }
   0x9   : > { %914 = vmatprep.subr.msk.bf16.mxu1 (!%p178_p3), %vm308_vm0, %v942_v1  ;;  %915 = vmatprep.subr.msk.bf16.mxu0 (!%p178_p3), %vm308_vm0, %v945_v3 }
   0xe   : > { %s1087_s12 = smov (!%p215_p4, %s970_s12), 1 }
   0xf   : > { %s916_s22 = smul.u32 72, %s1087_s12  ;;  %s848_s28 = sshll.u32 %s1087_s12, 6 }
  0x10   : > { %s1059_s4 = scalar_lea.vmem %s1081_s3, %s848_s28 }
  0x11   : > { %s219_s25 = scalar_lea.vmem %s1078_s0, %s916_s22 }
  0x12   : > { %v943_v5 = vld [vmem:[%s219_s25 + $0x24] sm:$0xff]   ;;  %v946_v7 = vld [vmem:[%s219_s25 + $0x2c] sm:$0xff]   ;;  %v948_v10 = vld [vmem:[%s219_s25 + $0x34] sm:$0xff]  }
  0x13   : > { %v944_v6 = vld [vmem:[%s219_s25] sm:$0xff]   ;;  %866 = vmatprep.mubr.msk.bf16.mxu1 %vm295_vm1, %v943_v5  ;;  %v947_v8 = vld [vmem:[%s219_s25 + $0x8] sm:$0xff]   ;;  %v952_v13 = vld [vmem:[%s219_s25 + $0x10] sm:$0xff]  }
  0x14   : > { %876 = vmatprep.mubr.msk.bf16.mxu0 %vm295_vm1, %v944_v6  ;;  %867 = vmatmul.mubr.msk.bf16.vlgmr.msra.gmra.mrb[0].mxu1 %vm295_vm1, %v946_v7  ;;  %v950_v11 = vld [vmem:[%s219_s25 + $0x4] sm:$0xff]   ;;  %v949_v12 = vld [vmem:[%s219_s25 + $0x3c] sm:$0xff]   ;;  %v951_v14 = vld [vmem:[%s219_s25 + $0xc] sm:$0xff]  }
  0x15   : > { %895 = vmatpush3.bf16.msra.mxu1 %v415_v4  ;;  %877 = vmatmul.mubr.msk.bf16.vlgmr.msra.gmra.mrb[0].mxu0 %vm295_vm1, %v947_v8  ;;  %v953_v15 = vld [vmem:[%s219_s25 + $0x14] sm:$0xff]   ;;  %v955_v17 = vld [vmem:[%s219_s25 + $0x1c] sm:$0xff]  }
  0x16   : > { %885 = vmatpush3.bf16.msra.mxu0 %v536_v9  ;;  %870 = vmatprep.mubr.msk.bf16.mxu1 %vm295_vm1, %v948_v10  ;;  %v954_v16 = vld [vmem:[%s219_s25 + $0x18] sm:$0xff]  }
  0x17   : > { %886 = vmatprep.mubr.msk.bf16.mxu0 %vm295_vm1, %v950_v11 }
  0x1c   : > { %871 = vmatmul.mubr.msk.bf16.gmra.mrb[4].mxu1 %vm295_vm1, %v949_v12 }
  0x1d   : > { %880 = vmatprep.mubr.msk.bf16.mxu1 %vm295_vm1, %v952_v13 }
  0x21   : > { %887 = vmatmul.mubr.msk.bf16.vlgmr.msra.gmra.mrb[0].mxu0 %vm295_vm1, %v951_v14 }
  0x22   : > { %890 = vmatprep.mubr.msk.bf16.mxu0 %vm295_vm1, %v953_v15 }
  0x28   : > { %881 = vmatmul.mubr.msk.bf16.vlgmr.msra.gmra.mrb[4].mxu1 %vm295_vm1, %v954_v16 }
  0x29   : > { %891 = vmatmul.mubr.msk.bf16.gmra.mrb[4].mxu0 %vm295_vm1, %v955_v17 }
  0xe7   : > { %v868_v18 = vpop.f32.mrb[0].mxu1 }
  0xe8   : > { %v346_v19 = vpop.f32.mrb[1].mxu1 }
  0xe9   : > { %v869_v20 = vpop.f32.mrb[2].mxu1 }
  0xea   : > { %v349_v21 = vpop.f32.mrb[3].mxu1 }
  0xf4   : > { %v888_v22 = vpop.f32.mrb[0].mxu0 }
  0xf5   : > { %v896_v24 = vadd.f32 %v888_v22, %v868_v18  ;;  %v572_v25 = vpop.f32.mrb[1].mxu0 }
  0xf6   : > { %v897_v26 = vadd.f32 %v572_v25, %v346_v19  ;;  %v889_v27 = vpop.f32.mrb[2].mxu0 }
  0xf7   : > { %v620_v28 = vadd.f32 %v896_v24, %v845_v23  ;;  %v898_v29 = vadd.f32 %v889_v27, %v869_v20  ;;  %v575_v30 = vpop.f32.mrb[3].mxu0 }
  0xf8   : > { %v618_v31 = vadd.f32 %v897_v26, %v845_v23  ;;  %v899_v32 = vadd.f32 %v575_v30, %v349_v21 }
  0xf9   : > { %vm628_vm2 = vcmp.gt.f32.partialorder %v620_v28, 0.0  ;;  %v636_v33 = vmul.f32 0.1, %v620_v28  ;;  %v621_v34 = vadd.f32 %v898_v29, %v845_v23 }
  0xfa   : > { %vm626_vm3 = vcmp.gt.f32.partialorder %v618_v31, 0.0  ;;  %v634_v35 = vmul.f32 0.1, %v618_v31  ;;  %v619_v36 = vadd.f32 %v899_v32, %v845_v23 }
  0xfb   : > { %v644_v37 = vsel %vm628_vm2, %v620_v28, %v636_v33  ;;  %vm629_vm4 = vcmp.gt.f32.partialorder %v621_v34, 0.0  ;;  %v637_v38 = vmul.f32 0.1, %v621_v34  ;;  %v882_v39 = vpop.f32.mrb[4].mxu1 }
  0xfc   : > { %652 = vst [vmem:[%s1059_s4 + $0x10] sm:$0xff] %v644_v37  ;;  %v642_v40 = vsel %vm626_vm3, %v618_v31, %v634_v35  ;;  %vm627_vm5 = vcmp.gt.f32.partialorder %v619_v36, 0.0  ;;  %v635_v41 = vmul.f32 0.1, %v619_v36  ;;  %v892_v42 = vpop.f32.mrb[4].mxu0  ;;  %v467_v43 = vpop.f32.mrb[5].mxu1 }
  0xfd   : > { %650 = vst [vmem:[%s1059_s4] sm:$0xff] %v642_v40  ;;  %v645_v44 = vsel %vm629_vm4, %v621_v34, %v637_v38  ;;  %v900_v45 = vadd.f32 %v892_v42, %v882_v39  ;;  %v588_v46 = vpop.f32.mrb[5].mxu0  ;;  %v883_v47 = vpop.f32.mrb[6].mxu1 }
  0xfe   : > { %653 = vst [vmem:[%s1059_s4 + $0x18] sm:$0xff] %v645_v44  ;;  %v643_v48 = vsel %vm627_vm5, %v619_v36, %v635_v41  ;;  %v901_v49 = vadd.f32 %v588_v46, %v467_v43  ;;  %v893_v50 = vpop.f32.mrb[6].mxu0  ;;  %v470_v51 = vpop.f32.mrb[7].mxu1 }
  0xff   : > { %651 = vst [vmem:[%s1059_s4 + $0x8] sm:$0xff] %v643_v48  ;;  %v624_v52 = vadd.f32 %v900_v45, %v845_v23  ;;  %v902_v53 = vadd.f32 %v893_v50, %v883_v47  ;;  %v591_v54 = vpop.f32.mrb[7].mxu0 }
 0x100   : > { %v622_v55 = vadd.f32 %v901_v49, %v845_v23  ;;  %v903_v56 = vadd.f32 %v591_v54, %v470_v51 }
 0x101   : > { %vm632_vm6 = vcmp.gt.f32.partialorder %v624_v52, 0.0  ;;  %v640_v57 = vmul.f32 0.1, %v624_v52  ;;  %v625_v58 = vadd.f32 %v902_v53, %v845_v23 }
 0x102   : > { %vm630_vm7 = vcmp.gt.f32.partialorder %v622_v55, 0.0  ;;  %v638_v59 = vmul.f32 0.1, %v622_v55  ;;  %v623_v60 = vadd.f32 %v903_v56, %v845_v23 }
 0x103   : > { %v648_v61 = vsel %vm632_vm6, %v624_v52, %v640_v57  ;;  %vm633_vm8 = vcmp.gt.f32.partialorder %v625_v58, 0.0  ;;  %v641_v62 = vmul.f32 0.1, %v625_v58 }
 0x104   : > { %656 = vst [vmem:[%s1059_s4 + $0x30] sm:$0xff] %v648_v61  ;;  %v646_v63 = vsel %vm630_vm7, %v622_v55, %v638_v59  ;;  %vm631_vm9 = vcmp.gt.f32.partialorder %v623_v60, 0.0  ;;  %v639_v0 = vmul.f32 0.1, %v623_v60 }
 0x105   : > { %654 = vst [vmem:[%s1059_s4 + $0x20] sm:$0xff] %v646_v63  ;;  %v649_v1 = vsel %vm633_vm8, %v625_v58, %v641_v62 }
 0x106   : > { %657 = vst [vmem:[%s1059_s4 + $0x38] sm:$0xff] %v649_v1  ;;  %v647_v2 = vsel %vm631_vm9, %v623_v60, %v639_v0 }
 0x107   : > { %655 = vst [vmem:[%s1059_s4 + $0x28] sm:$0xff] %v647_v2 }
 0x108 PF: > { %s13_s14 = sadd.s32 1, %s978_s14   ;;  %s1082_s12 = smov %s974_s13 }
 0x109   : > { %p10_p5 = scmp.ge.s32.totalorder %s13_s14, 4   ;;  %s1083_s13 = smov %s1085_s15 }
 0x10b   :  { %12 = sbr.rel (!%p10_p5) target bundleno = 2 (0x2), region = 73 }

</bundles_post_ra>
